<compile_context>
chip_gen: v5e
topology: v5e:2x2
jax: 0.10.0
libtpu: 0.0.40
codegen_flags: <defaults>
</compile_context>

<pallas_src>
import functools

import numpy as np
import jax
import jax.numpy as jnp
from jax import lax
from jax.experimental import pallas as pl
from jax.experimental.pallas import tpu as pltpu

_EPS = 1e-5


# --------------------------------------------------------------------------- #
# Fused Pallas kernel: conv1x1+BN+ReLU -> conv3x3+BN+ReLU -> conv1x1+BN -> + x
# --------------------------------------------------------------------------- #
def _bottleneck_kernel(x_ref, m_ref, w1_ref, b1_ref, w2_ref, w3_ref, o_ref,
                       *, W, dilation, n_img):
    # Per grid step (Nb images):
    #   x_ref : (Nb, C, HW)        channels on sublanes, flattened spatial on lanes
    #   m_ref : (8, HW)            precomputed border masks (8 non-center taps)
    #   w1_ref: (Cmid, C)          bf16, conv1 1x1 weight, bn1 scale folded in
    #   b1_ref: (Cmid, 1)          f32, bn1 shift
    #   w2_ref: (Cmid+1, 9*Cmid+1) bf16, conv2 3x3 (tap-major) + bn2 scale/shift;
    #                              last row builds a ones channel for bn3's shift
    #   w3_ref: (C, Cmid+1)        bf16, conv3 1x1 + bn3 scale; last col = bn3 shift
    #   o_ref : (Nb, C, HW)
    HW = x_ref.shape[-1]

    # Hoisted once per grid step (shared by all Nb images in the block).
    w1 = w1_ref[...].astype(jnp.float32)
    w2 = w2_ref[...].astype(jnp.float32)
    w3 = w3_ref[...].astype(jnp.float32)
    b1 = b1_ref[...]
    masks = m_ref[...]
    ones_row = jnp.ones((1, HW), jnp.float32)

    for i in range(n_img):                       # static unroll; n_img is small
        x = x_ref[i]                             # (C, HW)

        # --- conv1 (1x1) + bn1 + relu: one lane-dense MXU dot ---------------- #
        h = jnp.dot(w1, x, preferred_element_type=jnp.float32)
        h = jnp.maximum(h + b1, 0.0)             # (Cmid, HW)

        # --- conv2 (3x3, padding == dilation) + bn2 + relu ------------------- #
        # Nine shifted taps via lane rolls (XLU) * precomputed border masks,
        # all contracted in ONE K = 9*Cmid+1 dot (bn2 shift via the ones row).
        taps = []
        mi = 0
        for dy in (-1, 0, 1):
            for dx in (-1, 0, 1):
                if dy == 0 and dx == 0:
                    taps.append(h)
                    continue
                s = (dy * W + dx) * dilation     # want tap[p] = h[p + s]
                t = pltpu.roll(h, shift=(-s) % HW, axis=1)
                taps.append(t * masks[mi:mi + 1])
                mi += 1
        taps.append(ones_row)                    # carries bn2's shift through dot
        taps = jnp.concatenate(taps, axis=0)     # (9*Cmid + 1, HW)
        h2 = jnp.dot(w2, taps, preferred_element_type=jnp.float32)
        h2 = jnp.maximum(h2, 0.0)                # (Cmid+1, HW); last row == 1

        # --- conv3 (1x1) + bn3 (shift via ones row), residual add ------------ #
        ext = jnp.dot(w3, h2, preferred_element_type=jnp.float32)
        o_ref[i] = x + ext                       # lane-dense store


# --------------------------------------------------------------------------- #
# Wrapper: BN folding, mask precompute, batch blocking, single pallas_call
# --------------------------------------------------------------------------- #
def _fold_bn(gamma, beta, mean, var):
    s = gamma / jnp.sqrt(var + _EPS)
    return s, beta - mean * s


def _border_masks(H, W, dilation):
    """(8, H*W) f32 validity masks for the 8 non-center 3x3 taps (numpy, free)."""
    yy, xx = np.meshgrid(np.arange(H), np.arange(W), indexing="ij")
    yy = yy.reshape(-1)
    xx = xx.reshape(-1)
    rows = []
    for dy in (-1, 0, 1):
        for dx in (-1, 0, 1):
            if dy == 0 and dx == 0:
                continue
            v = ((yy + dy * dilation >= 0) & (yy + dy * dilation < H) &
                 (xx + dx * dilation >= 0) & (xx + dx * dilation < W))
            rows.append(v.astype(np.float32))
    return jnp.asarray(np.stack(rows, axis=0))


def regular_bottleneck_forward(x_nchw, params, *, dilation=1, images_per_step=None):
    """Inference-mode RegularBottleneck (asymmetric=False, kernel_size=3,
    padding=dilation, dropout_prob=0), fused into one Pallas call."""
    N, C, H, W = x_nchw.shape
    HW = H * W
    w1, w2, w3 = params["w1"], params["w2"], params["w3"]
    Cmid = w1.shape[0]

    s1, t1 = _fold_bn(*params["bn1"])
    s2, t2 = _fold_bn(*params["bn2"])
    s3, t3 = _fold_bn(*params["bn3"])

    # conv1: fold bn1 scale into the weight; bn1 shift stays one broadcast add.
    w1k = (w1[:, :, 0, 0] * s1[:, None]).astype(jnp.bfloat16)          # (Cmid, C)
    b1 = t1[:, None].astype(jnp.float32)                               # (Cmid, 1)

    # conv2 augmented: (Cmid+1, 9*Cmid+1).
    #  * OIHW -> (O, kh, kw, I) -> (O, 9*I) tap-major, matching the kernel's
    #    (dy, dx) loop order; bn2 scale folded in.
    #  * last COLUMN = bn2 shift (consumed by the ones row appended to taps).
    #  * last ROW    = zeros except a 1 in the last column -> after relu it
    #    yields a ones channel that carries bn3's shift through conv3.
    w2t = jnp.transpose(w2, (0, 2, 3, 1)).reshape(Cmid, 9 * Cmid) * s2[:, None]
    w2a = jnp.zeros((Cmid + 1, 9 * Cmid + 1), jnp.float32)
    w2a = w2a.at[:Cmid, :9 * Cmid].set(w2t)
    w2a = w2a.at[:Cmid, 9 * Cmid].set(t2)
    w2a = w2a.at[Cmid, 9 * Cmid].set(1.0)
    w2a = w2a.astype(jnp.bfloat16)

    # conv3 augmented: (C, Cmid+1); bn3 scale folded, last column = bn3 shift.
    w3a = jnp.concatenate([w3[:, :, 0, 0] * s3[:, None], t3[:, None]],
                          axis=1).astype(jnp.bfloat16)

    masks = _border_masks(H, W, dilation)                              # (8, HW)

    # Batch blocking: default to a 2-step "parallel" grid (keeps both v7x
    # TensorCores busy) with N/2 images per step; on single-TC chips these are
    # just two fat steps.  Weights/masks use constant index_maps -> fetched once.
    if images_per_step is None:
        images_per_step = N // 2 if (N % 2 == 0 and N >= 2) else 1
    assert N % images_per_step == 0, (N, images_per_step)
    nb = images_per_step
    steps = N // nb

    x2 = x_nchw.reshape(N, C, HW)          # free row-major reshape, stays NCHW

    kern = functools.partial(_bottleneck_kernel, W=W, dilation=dilation, n_img=nb)
    # VMEM high-water mark per step (f32): taps (9*Cmid+1)*HW + double-buffered
    # x/out blocks (2*2*nb*C*HW) + bf16 weights/masks.  KB-scale at these shapes;
    # see the TODO at the top before H*W grows toward v7x's 64 MiB VMEM.
    out = pl.pallas_call(
        kern,
        out_shape=jax.ShapeDtypeStruct((N, C, HW), jnp.float32),
        grid=(steps,),
        in_specs=[
            pl.BlockSpec((nb, C, HW), lambda n: (n, 0, 0)),
            pl.BlockSpec((8, HW), lambda n: (0, 0)),
            pl.BlockSpec((Cmid, C), lambda n: (0, 0)),
            pl.BlockSpec((Cmid, 1), lambda n: (0, 0)),
            pl.BlockSpec((Cmid + 1, 9 * Cmid + 1), lambda n: (0, 0)),
            pl.BlockSpec((C, Cmid + 1), lambda n: (0, 0)),
        ],
        out_specs=pl.BlockSpec((nb, C, HW), lambda n: (n, 0, 0)),
        compiler_params=pltpu.CompilerParams(dimension_semantics=("parallel",)),
    )(x2, masks, w1k, b1, w2a, w3a)
    return out.reshape(N, C, H, W)


# --------------------------------------------------------------------------- #
# Parameter init (PyTorch layouts) + pure-JAX reference
# --------------------------------------------------------------------------- #
def init_params(key, channels, internal_channels):
    k1, k2, k3, k4, k5, k6 = jax.random.split(key, 6)
    w1 = jax.random.normal(k1, (internal_channels, channels, 1, 1), jnp.float32) * 0.5
    w2 = jax.random.normal(k2, (internal_channels, internal_channels, 3, 3),
                           jnp.float32) * 0.25
    w3 = jax.random.normal(k3, (channels, internal_channels, 1, 1), jnp.float32) * 0.2

    def bn(k, c, vscale):
        return (1.0 + 0.1 * jax.random.normal(k, (c,), jnp.float32),   # gamma
                0.05 * jnp.arange(c, dtype=jnp.float32) - 0.1,          # beta
                0.03 * jnp.arange(c, dtype=jnp.float32),                # running mean
                vscale * jnp.ones((c,), jnp.float32))                   # running var

    return dict(w1=w1, w2=w2, w3=w3,
                bn1=bn(k4, internal_channels, 1.5),
                bn2=bn(k5, internal_channels, 0.8),
                bn3=bn(k6, channels, 1.2))


def ref_forward(x, params, *, dilation=1):
    def bn(y, g, b, m, v):
        sh = (1, -1, 1, 1)
        return (y - m.reshape(sh)) * (g / jnp.sqrt(v + _EPS)).reshape(sh) + b.reshape(sh)

    dn = ("NCHW", "OIHW", "NCHW")
    p = dilation
    ext = lax.conv_general_dilated(x, params["w1"], (1, 1), "VALID",
                                   dimension_numbers=dn)
    ext = jnp.maximum(bn(ext, *params["bn1"]), 0.0)
    ext = lax.conv_general_dilated(ext, params["w2"], (1, 1), ((p, p), (p, p)),
                                   rhs_dilation=(dilation, dilation),
                                   dimension_numbers=dn)
    ext = jnp.maximum(bn(ext, *params["bn2"]), 0.0)
    ext = lax.conv_general_dilated(ext, params["w3"], (1, 1), "VALID",
                                   dimension_numbers=dn)
    ext = bn(ext, *params["bn3"])
    return x + ext                      # Dropout2d(p=0) == identity, no final act.


# --------------------------------------------------------------------------- #
if __name__ == "__main__":
    base_key = jax.random.PRNGKey(0)

    def run_case(N, C, Cmid, H, W, dilation, case_id):
        key = jax.random.fold_in(base_key, case_id)
        kx, kp = jax.random.split(key)
        x = jax.random.normal(kx, (N, C, H, W), jnp.float32)
        params = init_params(kp, C, Cmid)

        fwd = jax.jit(functools.partial(regular_bottleneck_forward,
                                        dilation=dilation))
        out = jax.block_until_ready(fwd(x, params))
        assert out.shape == (N, C, H, W), out.shape

        ref = jax.block_until_ready(
            jax.jit(functools.partial(ref_forward, dilation=dilation))(x, params))
        # Tolerance sized for single-pass bf16 MXU (default precision) in both
        # the Pallas kernel and the XLA reference path.
        np.testing.assert_allclose(np.asarray(out), np.asarray(ref),
                                   rtol=2e-2, atol=5e-2)

    # Spec-sized case: batch=2, channels=4, internal=8, 16x16, dilation=1
    # (2-step grid, 1 image per step).
    run_case(2, 4, 8, 16, 16, 1, 0)
    # Batched-step + dilation case: 2 images per grid step, dilation=2,
    # non-power-of-two W (24), H*W multiple of 128.
    run_case(4, 6, 8, 16, 24, 2, 1)

    print("KERNEL_OK")
</pallas_src>

<mosaic_0001>
module attributes {stable_mosaic.version = 11 : i64} {
  func.func @_bottleneck_kernel(%arg0: i32, %arg1: memref<1x4x256xf32, #tpu.memory_space<vmem>>, %arg2: memref<8x256xf32, #tpu.memory_space<vmem>>, %arg3: memref<8x4xbf16, #tpu.memory_space<vmem>>, %arg4: memref<8x1xf32, #tpu.memory_space<vmem>>, %arg5: memref<9x73xbf16, #tpu.memory_space<vmem>>, %arg6: memref<4x9xbf16, #tpu.memory_space<vmem>>, %arg7: memref<1x4x256xf32, #tpu.memory_space<vmem>>) attributes {dimension_semantics = [#tpu.dimension_semantics<parallel>], iteration_bounds = array<i64: 2>, scalar_prefetch = 0 : i64, scratch_operands = 0 : i64, tpu.core_type = #tpu.core_type<tc>, window_params = [{transform_indices = @transform_0, window_bounds = array<i64: 1, 4, 256>}, {pipeline_mode = #tpu.pipeline_mode<synchronous>, transform_indices = @transform_1, window_bounds = array<i64: 8, 256>}, {pipeline_mode = #tpu.pipeline_mode<synchronous>, transform_indices = @transform_2, window_bounds = array<i64: 8, 4>}, {pipeline_mode = #tpu.pipeline_mode<synchronous>, transform_indices = @transform_3, window_bounds = array<i64: 8, 1>}, {pipeline_mode = #tpu.pipeline_mode<synchronous>, transform_indices = @transform_4, window_bounds = array<i64: 9, 73>}, {pipeline_mode = #tpu.pipeline_mode<synchronous>, transform_indices = @transform_5, window_bounds = array<i64: 4, 9>}, {transform_indices = @transform_6, window_bounds = array<i64: 1, 4, 256>}]} {
    %c0 = arith.constant 0 : index
    %c0_0 = arith.constant 0 : index
    %0 = vector.load %arg3[%c0, %c0_0] : memref<8x4xbf16, #tpu.memory_space<vmem>>, vector<8x4xbf16>
    %1 = arith.extf %0 : vector<8x4xbf16> to vector<8x4xf32>
    %c0_1 = arith.constant 0 : index
    %c0_2 = arith.constant 0 : index
    %2 = vector.load %arg5[%c0_1, %c0_2] : memref<9x73xbf16, #tpu.memory_space<vmem>>, vector<9x73xbf16>
    %3 = arith.extf %2 : vector<9x73xbf16> to vector<9x73xf32>
    %c0_3 = arith.constant 0 : index
    %c0_4 = arith.constant 0 : index
    %4 = vector.load %arg6[%c0_3, %c0_4] : memref<4x9xbf16, #tpu.memory_space<vmem>>, vector<4x9xbf16>
    %5 = arith.extf %4 : vector<4x9xbf16> to vector<4x9xf32>
    %c0_5 = arith.constant 0 : index
    %c0_6 = arith.constant 0 : index
    %6 = vector.load %arg4[%c0_5, %c0_6] : memref<8x1xf32, #tpu.memory_space<vmem>>, vector<8x1xf32>
    %c0_7 = arith.constant 0 : index
    %c0_8 = arith.constant 0 : index
    %7 = vector.load %arg2[%c0_7, %c0_8] : memref<8x256xf32, #tpu.memory_space<vmem>>, vector<8x256xf32>
    %cst = arith.constant 1.000000e+00 : f32
    %8 = vector.broadcast %cst : f32 to vector<1x256xf32>
    %c0_9 = arith.constant 0 : index
    %c0_10 = arith.constant 0 : index
    %c0_11 = arith.constant 0 : index
    %9 = vector.load %arg1[%c0_9, %c0_10, %c0_11] : memref<1x4x256xf32, #tpu.memory_space<vmem>>, vector<1x4x256xf32>
    %10 = vector.shape_cast %9 : vector<1x4x256xf32> to vector<4x256xf32>
    %cst_12 = arith.constant dense<0.000000e+00> : vector<8x256xf32>
    %11 = tpu.matmul %1, %10, %cst_12 {dimension_numbers = #tpu.dot_dimension_numbers<[1], [0], [0], [1], [0, 0, 1, 1], [], []>} : vector<8x4xf32>, vector<4x256xf32>, vector<8x256xf32> -> vector<8x256xf32>
    %12 = vector.broadcast %6 : vector<8x1xf32> to vector<8x256xf32>
    %13 = arith.addf %11, %12 : vector<8x256xf32>
    %cst_13 = arith.constant 0.000000e+00 : f32
    %14 = vector.broadcast %cst_13 : f32 to vector<8x256xf32>
    %15 = arith.maximumf %13, %14 : vector<8x256xf32>
    %c17_i32 = arith.constant 17 : i32
    %16 = tpu.dynamic_rotate %15 by %c17_i32 dim 1 : vector<8x256xf32>, i32 -> vector<8x256xf32>
    %17 = vector.extract_strided_slice %7 {offsets = [0, 0], sizes = [1, 256], strides = [1, 1]} : vector<8x256xf32> to vector<1x256xf32>
    %18 = vector.broadcast %17 : vector<1x256xf32> to vector<8x256xf32>
    %19 = arith.mulf %16, %18 : vector<8x256xf32>
    %c16_i32 = arith.constant 16 : i32
    %20 = tpu.dynamic_rotate %15 by %c16_i32 dim 1 : vector<8x256xf32>, i32 -> vector<8x256xf32>
    %21 = vector.extract_strided_slice %7 {offsets = [1, 0], sizes = [1, 256], strides = [1, 1]} : vector<8x256xf32> to vector<1x256xf32>
    %22 = vector.broadcast %21 : vector<1x256xf32> to vector<8x256xf32>
    %23 = arith.mulf %20, %22 : vector<8x256xf32>
    %c15_i32 = arith.constant 15 : i32
    %24 = tpu.dynamic_rotate %15 by %c15_i32 dim 1 : vector<8x256xf32>, i32 -> vector<8x256xf32>
    %25 = vector.extract_strided_slice %7 {offsets = [2, 0], sizes = [1, 256], strides = [1, 1]} : vector<8x256xf32> to vector<1x256xf32>
    %26 = vector.broadcast %25 : vector<1x256xf32> to vector<8x256xf32>
    %27 = arith.mulf %24, %26 : vector<8x256xf32>
    %c1_i32 = arith.constant 1 : i32
    %28 = tpu.dynamic_rotate %15 by %c1_i32 dim 1 : vector<8x256xf32>, i32 -> vector<8x256xf32>
    %29 = vector.extract_strided_slice %7 {offsets = [3, 0], sizes = [1, 256], strides = [1, 1]} : vector<8x256xf32> to vector<1x256xf32>
    %30 = vector.broadcast %29 : vector<1x256xf32> to vector<8x256xf32>
    %31 = arith.mulf %28, %30 : vector<8x256xf32>
    %c255_i32 = arith.constant 255 : i32
    %32 = tpu.dynamic_rotate %15 by %c255_i32 dim 1 : vector<8x256xf32>, i32 -> vector<8x256xf32>
    %33 = vector.extract_strided_slice %7 {offsets = [4, 0], sizes = [1, 256], strides = [1, 1]} : vector<8x256xf32> to vector<1x256xf32>
    %34 = vector.broadcast %33 : vector<1x256xf32> to vector<8x256xf32>
    %35 = arith.mulf %32, %34 : vector<8x256xf32>
    %c241_i32 = arith.constant 241 : i32
    %36 = tpu.dynamic_rotate %15 by %c241_i32 dim 1 : vector<8x256xf32>, i32 -> vector<8x256xf32>
    %37 = vector.extract_strided_slice %7 {offsets = [5, 0], sizes = [1, 256], strides = [1, 1]} : vector<8x256xf32> to vector<1x256xf32>
    %38 = vector.broadcast %37 : vector<1x256xf32> to vector<8x256xf32>
    %39 = arith.mulf %36, %38 : vector<8x256xf32>
    %c240_i32 = arith.constant 240 : i32
    %40 = tpu.dynamic_rotate %15 by %c240_i32 dim 1 : vector<8x256xf32>, i32 -> vector<8x256xf32>
    %41 = vector.extract_strided_slice %7 {offsets = [6, 0], sizes = [1, 256], strides = [1, 1]} : vector<8x256xf32> to vector<1x256xf32>
    %42 = vector.broadcast %41 : vector<1x256xf32> to vector<8x256xf32>
    %43 = arith.mulf %40, %42 : vector<8x256xf32>
    %c239_i32 = arith.constant 239 : i32
    %44 = tpu.dynamic_rotate %15 by %c239_i32 dim 1 : vector<8x256xf32>, i32 -> vector<8x256xf32>
    %45 = vector.extract_strided_slice %7 {offsets = [7, 0], sizes = [1, 256], strides = [1, 1]} : vector<8x256xf32> to vector<1x256xf32>
    %46 = vector.broadcast %45 : vector<1x256xf32> to vector<8x256xf32>
    %47 = arith.mulf %44, %46 : vector<8x256xf32>
    %48 = tpu.concatenate %19, %23, %27, %31, %15, %35, %39, %43, %47, %8 in 0 : vector<8x256xf32>, vector<8x256xf32>, vector<8x256xf32>, vector<8x256xf32>, vector<8x256xf32>, vector<8x256xf32>, vector<8x256xf32>, vector<8x256xf32>, vector<8x256xf32>, vector<1x256xf32> -> vector<73x256xf32>
    %cst_14 = arith.constant dense<0.000000e+00> : vector<9x256xf32>
    %49 = tpu.matmul %3, %48, %cst_14 {dimension_numbers = #tpu.dot_dimension_numbers<[1], [0], [0], [1], [0, 0, 1, 1], [], []>} : vector<9x73xf32>, vector<73x256xf32>, vector<9x256xf32> -> vector<9x256xf32>
    %cst_15 = arith.constant 0.000000e+00 : f32
    %50 = vector.broadcast %cst_15 : f32 to vector<9x256xf32>
    %51 = arith.maximumf %49, %50 : vector<9x256xf32>
    %cst_16 = arith.constant dense<0.000000e+00> : vector<4x256xf32>
    %52 = tpu.matmul %5, %51, %cst_16 {dimension_numbers = #tpu.dot_dimension_numbers<[1], [0], [0], [1], [0, 0, 1, 1], [], []>} : vector<4x9xf32>, vector<9x256xf32>, vector<4x256xf32> -> vector<4x256xf32>
    %53 = arith.addf %10, %52 : vector<4x256xf32>
    %c0_17 = arith.constant 0 : index
    %c0_18 = arith.constant 0 : index
    %c0_19 = arith.constant 0 : index
    %54 = vector.load %arg7[%c0_17, %c0_18, %c0_19] : memref<1x4x256xf32, #tpu.memory_space<vmem>>, vector<1x4x256xf32>
    %55 = vector.shape_cast %54 : vector<1x4x256xf32> to vector<4x256xf32>
    %56 = vector.shape_cast %53 : vector<4x256xf32> to vector<1x4x256xf32>
    tpu.vector_store %arg7[%c0_17, %c0_18, %c0_19], %56 {strides = array<i32>} : memref<1x4x256xf32, #tpu.memory_space<vmem>>, vector<1x4x256xf32>,
    return
  }
  func.func @transform_0(%arg0: i32) -> (i32, i32, i32) {
    %c0_i32 = arith.constant 0 : i32
    %c0_i32_0 = arith.constant 0 : i32
    %c0_i32_1 = arith.constant 0 : i32
    return %arg0, %c0_i32, %c0_i32_0 : i32, i32, i32
  }
  func.func @transform_1(%arg0: i32) -> (i32, i32) {
    %c0_i32 = arith.constant 0 : i32
    %c0_i32_0 = arith.constant 0 : i32
    %c0_i32_1 = arith.constant 0 : i32
    return %c0_i32, %c0_i32_0 : i32, i32
  }
  func.func @transform_2(%arg0: i32) -> (i32, i32) {
    %c0_i32 = arith.constant 0 : i32
    %c0_i32_0 = arith.constant 0 : i32
    %c0_i32_1 = arith.constant 0 : i32
    return %c0_i32, %c0_i32_0 : i32, i32
  }
  func.func @transform_3(%arg0: i32) -> (i32, i32) {
    %c0_i32 = arith.constant 0 : i32
    %c0_i32_0 = arith.constant 0 : i32
    %c0_i32_1 = arith.constant 0 : i32
    return %c0_i32, %c0_i32_0 : i32, i32
  }
  func.func @transform_4(%arg0: i32) -> (i32, i32) {
    %c0_i32 = arith.constant 0 : i32
    %c0_i32_0 = arith.constant 0 : i32
    %c0_i32_1 = arith.constant 0 : i32
    return %c0_i32, %c0_i32_0 : i32, i32
  }
  func.func @transform_5(%arg0: i32) -> (i32, i32) {
    %c0_i32 = arith.constant 0 : i32
    %c0_i32_0 = arith.constant 0 : i32
    %c0_i32_1 = arith.constant 0 : i32
    return %c0_i32, %c0_i32_0 : i32, i32
  }
  func.func @transform_6(%arg0: i32) -> (i32, i32, i32) {
    %c0_i32 = arith.constant 0 : i32
    %c0_i32_0 = arith.constant 0 : i32
    %c0_i32_1 = arith.constant 0 : i32
    return %arg0, %c0_i32, %c0_i32_0 : i32, i32, i32
  }
}

</mosaic_0001>

<bundles_post_ra>
// kernel: regular_bottleneck_forward.1
= control target key start
LH: loop header
LB: loop body
LE: loop exit
PB: predicated region body
PF: predicated region fallthrough
CT: control target
= control target key end

     0   :  { %s686_s21 = smov 0   ;;  %s794_s0 = inlined_call_operand.vmem [shape: f32[2,4,256], index: 0, kind: input, shape index: {}]   ;;  %s795_s1 = inlined_call_operand.vmem [shape: f32[8,256], index: 1, kind: input, shape index: {}]   ;;  %s796_s2 = inlined_call_operand.vmem [shape: bf16[8,4], index: 2, kind: input, shape index: {}]   ;;  %s797_s3 = inlined_call_operand.vmem [shape: f32[8,1], index: 3, kind: input, shape index: {}]   ;;  %s798_s4 = inlined_call_operand.vmem [shape: bf16[9,73], index: 4, kind: input, shape index: {}]   ;;  %s799_s5 = inlined_call_operand.vmem [shape: bf16[4,9], index: 5, kind: input, shape index: {}]   ;;  %s800_s6 = inlined_call_operand.vmem [shape: f32[2,4,256], index: 6, kind: output, shape index: {}]  }
   0x1 LB: > { %s587_s22 = sadd.s32 4294967295, %s639_s21   ;;  %p591_p0 = scmp.ge.s32.totalorder %s639_s21, 1  ;;  %s639_s21 = sphi %s686_s21, %s16_s21  }
   0x2   : > { %p212_p1 = scmp.lt.s32.totalorder %s639_s21, 3 }
   0x4   : > { %p213_p2 = pnand %p591_p0, %p212_p1 }
   0x5   : > { %p242_p3 = scmp.lt.s32.totalorder (!%p213_p2), %s587_s22, 1  ;;  %s642_s7 = smov (!%p213_p2), 112  }
   0x6   : > { %216 = sbr.rel (%p213_p2) target bundleno = 590 (0x24e), region = 44  ;;  %s643_s8 = smov (!%p213_p2), 111  }
   0x7   : > { %s644_s9 = smov (!%p213_p2), 113   ;;  %s645_s10 = smov (!%p213_p2), 127  }
   0x8   : > { %s646_s11 = smov (!%p213_p2), 1   ;;  %s647_s12 = smov (!%p213_p2), 15  }
   0x9   : > { %s648_s13 = smov (!%p213_p2), 16   ;;  %s649_s14 = smov (!%p213_p2), 17  }
   0xb   : > { %v641_v0 = vmov 0   ;;  %v260_v1 = vld [vmem:[%s797_s3] sm:$0xff]  ;;  %s802_s22 = smov (!%p242_p3, %s587_s22), 1  ;;  %vm277_vm0 = vcmask 1043456   ;;  %vm273_vm1 = vcmask 31744   ;;  %vm421_vm2 = vcmask 1040384  }
   0xc   : > { %632 = vset.pattern.permute.xlu0 %v641_v0  ;;  %s612_s25 = sshll.u32 %s802_s22, 3  ;;  %v252_v3 = vld [vmem:[%s796_s2] sm:$0xf]  ;;  %v650_v14 = vmov 1.0   ;;  %v328_v15 = vlaneseq  ;;  %v745_v19 = vld [vmem:[%s795_s1 + $0x8] sm:$0xff]  ;;  %vm414_vm11 = vcmask 596992  }
   0xd   : > { %266 = vperm.xlu0 %632, %v260_v1   ;;  %s246_s28 = scalar_lea.vmem %s794_s0, %s612_s25  ;;  %v253_v4 = vunpack.c.l.bf16 %v252_v3  ;;  %600 = vmatpush.msk.msra.mxu2 %vm421_vm2, %v650_v14  ;;  %v740_v18 = vld [vmem:[%s795_s1] sm:$0xff]  ;;  %v411_v21 = vperm.slane %v745_v19, 7  ;;  %v400_v30 = vperm.slane %v745_v19, 6  ;;  %v389_v33 = vperm.slane %v745_v19, 5  ;;  %s251_s30 = scalar_lea.vmem %s800_s6, %s612_s25 }
   0xe   : > { %v705_v2 = vld [vmem:[%s246_s28] sm:$0xff]  ;;  %603 = vmatpush.msk.msra.mxu3 %vm421_vm2, %v650_v14  ;;  %v735_v17 = vand.u32 127, %v328_v15  ;;  %v410_v20 = vperm.slane %v740_v18, 7  ;;  %v399_v29 = vperm.slane %v740_v18, 6  ;;  %v388_v32 = vperm.slane %v740_v18, 5 }
   0xf   : > { %270 = vst [vmem:[#allocation1] ss:$2 sm:$0xff] %v705_v2  ;;  %v377_v44 = vperm.slane %v740_v18, 4  ;;  %v378_v45 = vperm.slane %v745_v19, 4  ;;  %v366_v53 = vperm.slane %v740_v18, 3  ;;  %v367_v54 = vperm.slane %v745_v19, 3 }
  0x10   : > { %vm407_vm3 = vcmp.lt.s32.totalorder %v735_v17, 111  ;;  %vm396_vm4 = vcmp.lt.s32.totalorder %v735_v17, 112  ;;  %vm385_vm5 = vcmp.lt.s32.totalorder %v735_v17, 113  ;;  %vm374_vm6 = vcmp.lt.s32.totalorder %v735_v17, 127  ;;  %v254_v14 = vld [vmem:[%s798_s4] sm:$0xf] }
  0x11   : > { %vm363_vm7 = vcmp.lt.s32.totalorder %v735_v17, 1  ;;  %vm352_vm8 = vcmp.lt.s32.totalorder %v735_v17, 15  ;;  %v355_v56 = vperm.slane %v740_v18, 2  ;;  %v356_v57 = vperm.slane %v745_v19, 2 }
  0x12   : > { %vm341_vm9 = vcmp.lt.s32.totalorder %v735_v17, 16  ;;  %vm330_vm10 = vcmp.lt.s32.totalorder %v735_v17, 17  ;;  %v255_v17 = vld [vmem:[%s798_s4 + $0x4] sm:$0x1]  ;;  %vm475_vm12 = vcmask 72704  }
  0x16   : > { %v271_v5 = vld.sshfl [vmem:[#allocation1] sm:$0xff pattern:$0x75316420]  ;;  %v272_v6 = vld.sshfl [vmem:[#allocation1 + $0x8] sm:$0xff pattern:$0x75316420] }
  0x17   : > { %596 = vmatpush.msk.msra.mxu0 %vm277_vm0, %v271_v5  ;;  %598 = vmatpush.msk.msra.mxu1 %vm277_vm0, %v272_v6  ;;  %v345_v5 = vperm.slane %v745_v19, 1 }
  0x18   : > { %597 = vmatmul.msk.f32.vlgmr.msra.gmra.mxu0 %vm273_vm1, %v253_v4  ;;  %599 = vmatmul.msk.f32.vlgmr.msra.gmra.mxu1 %vm273_vm1, %v253_v4  ;;  %v344_v4 = vperm.slane %v740_v18, 1 }
  0x7f   : > { %v267_v7 = vpop.permute.xlu0 %266 }
  0x95   : > { %v299_v8 = vpop.f32.mrf.mxu0  ;;  %v319_v9 = vpop.f32.mrf.mxu1 }
  0x96   : > { %v300_v10 = vadd.f32 %v299_v8, %v267_v7  ;;  %v320_v11 = vadd.f32 %v319_v9, %v267_v7 }
  0x98   : > { %v713_v12 = vmax.f32 %v300_v10, 0.0  ;;  %v715_v13 = vmax.f32 %v320_v11, 0.0 }
  0x9a   : > { %394 = vrot.lane.b32.xlu2 %v715_v13, %s642_s7  ;;  %405 = vrot.lane.b32.xlu1 %v715_v13, %s643_s8 }
  0x9b   : > { %403 = vrot.lane.b32.xlu0 %v713_v12, %s643_s8 }
  0xa2   : > { %381 = vrot.lane.b32.xlu2 %v713_v12, %s644_s9  ;;  %392 = vrot.lane.b32.xlu1 %v713_v12, %s642_s7 }
  0xa3   : > { %383 = vrot.lane.b32.xlu0 %v715_v13, %s644_s9 }
  0xaa   : > { %372 = vrot.lane.b32.xlu2 %v715_v13, %s645_s10  ;;  %370 = vrot.lane.b32.xlu1 %v713_v12, %s645_s10 }
  0xab   : > { %359 = vrot.lane.b32.xlu0 %v713_v12, %s646_s11 }
  0xb2   : > { %348 = vrot.lane.b32.xlu2 %v713_v12, %s647_s12  ;;  %361 = vrot.lane.b32.xlu1 %v715_v13, %s646_s11 }
  0xb3   : > { %350 = vrot.lane.b32.xlu0 %v715_v13, %s647_s12 }
  0xba   : > { %339 = vrot.lane.b32.xlu2 %v715_v13, %s648_s13  ;;  %337 = vrot.lane.b32.xlu1 %v713_v12, %s648_s13 }
  0xbb   : > { %324 = vrot.lane.b32.xlu0 %v713_v12, %s649_s14 }
  0xc2   : > { %326 = vrot.lane.b32.xlu1 %v715_v13, %s649_s14 }
  0xf4   : > { %v395_v16 = vpop.permute.xlu2 %394 }
  0xfc   : > { %v382_v24 = vpop.permute.xlu2 %381 }
 0x104   : > { %v373_v41 = vpop.permute.xlu2 %372 }
 0x10c   : > { %v406_v22 = vpop.permute.xlu1 %405  ;;  %v349_v52 = vpop.permute.xlu2 %348 }
 0x10d   : > { %v404_v23 = vpop.permute.xlu0 %403 }
 0x10e   : > { %v408_v25 = vsel %vm407_vm3, %v404_v23, %v406_v22  ;;  %v409_v26 = vsel %vm407_vm3, %v406_v22, %v404_v23  ;;  %v256_v22 = vunpack.c.l.bf16 %v254_v14 }
 0x10f   : > { %v412_v27 = vmul.f32 %v410_v20, %v408_v25  ;;  %v413_v28 = vmul.f32 %v411_v21, %v409_v26  ;;  %v258_v26 = vld [vmem:[%s799_s5] sm:$0x3] }
 0x111   : > { %432 = vmatpush.msra.mxu2 %v412_v27  ;;  %455 = vmatpush.msra.mxu3 %v413_v28 }
 0x114   : > { %v393_v31 = vpop.permute.xlu1 %392  ;;  %v340_v6 = vpop.permute.xlu2 %339 }
 0x115   : > { %v397_v34 = vsel %vm396_vm4, %v393_v31, %v395_v16  ;;  %v398_v35 = vsel %vm396_vm4, %v395_v16, %v393_v31  ;;  %v384_v36 = vpop.permute.xlu0 %383  ;;  %v259_v31 = vunpack.c.l.bf16 %v258_v26 }
 0x116   : > { %v386_v37 = vsel %vm385_vm5, %v382_v24, %v384_v36  ;;  %v387_v38 = vsel %vm385_vm5, %v384_v36, %v382_v24  ;;  %v401_v39 = vmul.f32 %v399_v29, %v397_v34  ;;  %v402_v40 = vmul.f32 %v400_v30, %v398_v35 }
 0x117   : > { %v390_v42 = vmul.f32 %v388_v32, %v386_v37  ;;  %v391_v43 = vmul.f32 %v389_v33, %v387_v38 }
 0x118   : > { %433 = vmatpush.msra.mxu2 %v401_v39  ;;  %456 = vmatpush.msra.mxu3 %v402_v40 }
 0x11a   : > { %434 = vmatpush.msra.mxu2 %v390_v42  ;;  %457 = vmatpush.msra.mxu3 %v391_v43 }
 0x11c   : > { %v371_v46 = vpop.permute.xlu1 %370 }
 0x11d   : > { %v375_v47 = vsel %vm374_vm6, %v371_v46, %v373_v41  ;;  %v376_v48 = vsel %vm374_vm6, %v373_v41, %v371_v46  ;;  %v360_v49 = vpop.permute.xlu0 %359 }
 0x11e   : > { %v379_v50 = vmul.f32 %v377_v44, %v375_v47  ;;  %v380_v51 = vmul.f32 %v378_v45, %v376_v48 }
 0x120   : > { %435 = vmatpush.msra.mxu2 %v379_v50  ;;  %458 = vmatpush.msra.mxu3 %v380_v51 }
 0x122   : > { %436 = vmatpush.msra.mxu2 %v713_v12  ;;  %459 = vmatpush.msra.mxu3 %v715_v13  ;;  %v333_v12 = vperm.slane %v740_v18, 0  ;;  %v334_v13 = vperm.slane %v745_v19, 0  ;;  %v257_v18 = vunpack.c.l.bf16 %v255_v17 }
 0x124   : > { %v362_v55 = vpop.permute.xlu1 %361 }
 0x125   : > { %v364_v58 = vsel %vm363_vm7, %v360_v49, %v362_v55  ;;  %v365_v59 = vsel %vm363_vm7, %v362_v55, %v360_v49  ;;  %v351_v60 = vpop.permute.xlu0 %350 }
 0x126   : > { %v353_v61 = vsel %vm352_vm8, %v349_v52, %v351_v60  ;;  %v354_v62 = vsel %vm352_vm8, %v351_v60, %v349_v52  ;;  %v368_v63 = vmul.f32 %v366_v53, %v365_v59  ;;  %v369_v0 = vmul.f32 %v367_v54, %v364_v58 }
 0x127   : > { %v357_v1 = vmul.f32 %v355_v56, %v354_v62  ;;  %v358_v3 = vmul.f32 %v356_v57, %v353_v61 }
 0x128   : > { %437 = vmatpush.msra.mxu2 %v368_v63  ;;  %460 = vmatpush.msra.mxu3 %v369_v0 }
 0x12a   : > { %438 = vmatpush.msra.mxu2 %v357_v1  ;;  %461 = vmatpush.msra.mxu3 %v358_v3 }
 0x12c   : > { %v338_v7 = vpop.permute.xlu1 %337 }
 0x12d   : > { %v342_v8 = vsel %vm341_vm9, %v338_v7, %v340_v6  ;;  %v343_v9 = vsel %vm341_vm9, %v340_v6, %v338_v7  ;;  %v325_v15 = vpop.permute.xlu0 %324 }
 0x12e   : > { %v346_v10 = vmul.f32 %v344_v4, %v343_v9  ;;  %v347_v11 = vmul.f32 %v345_v5, %v342_v8 }
 0x130   : > { %439 = vmatpush.msra.mxu2 %v346_v10  ;;  %462 = vmatpush.msra.mxu3 %v347_v11 }
 0x134   : > { %v327_v16 = vpop.permute.xlu1 %326 }
 0x135   : > { %v331_v20 = vsel %vm330_vm10, %v325_v15, %v327_v16  ;;  %v332_v21 = vsel %vm330_vm10, %v327_v16, %v325_v15 }
 0x136   : > { %v335_v23 = vmul.f32 %v333_v12, %v332_v21  ;;  %v336_v24 = vmul.f32 %v334_v13, %v331_v20 }
 0x138   : > { %440 = vmatpush.msra.mxu2 %v335_v23  ;;  %463 = vmatpush.msra.mxu3 %v336_v24 }
 0x139   : > { %601 = vmatmul.msk.f32.vlgmr.msra.gmra.mxu2 %vm414_vm11, %v256_v22  ;;  %604 = vmatmul.msk.f32.vlgmr.msra.gmra.mxu3 %vm414_vm11, %v256_v22 }
 0x141   : > { %602 = vmatmul.msk.f32.gmra.mxu2 %vm414_vm11, %v257_v18  ;;  %605 = vmatmul.msk.f32.gmra.mxu3 %vm414_vm11, %v257_v18 }
 0x1bc   : > { %v442_v19 = vpop.f32.mrf.mxu2  ;;  %v465_v25 = vpop.f32.mrf.mxu3 }
 0x1bd   : > { %v471_v32 = vmax.f32 %v442_v19, 0.0  ;;  %v472_v33 = vmax.f32 %v465_v25, 0.0 }
 0x1c4   : > { %v445_v27 = vpop.f32.mrf.mxu2  ;;  %v468_v28 = vpop.f32.mrf.mxu3 }
 0x1c5   : > { %v473_v29 = vmax.f32 %v445_v27, 0.0  ;;  %v474_v30 = vmax.f32 %v468_v28, 0.0 }
 0x1c7   : > { %606 = vmatpush.msk.msrb.mxu0 %vm421_vm2, %v473_v29  ;;  %608 = vmatpush.msk.msrb.mxu1 %vm421_vm2, %v474_v30 }
 0x1c9   : > { %500 = vmatpush.msrb.mxu0 %v471_v32  ;;  %520 = vmatpush.msrb.mxu1 %v472_v33 }
 0x1ca   : > { %609 = vmatmul.msk.f32.vlgmr.msrb.gmra.mxu1 %vm475_vm12, %v259_v31  ;;  %607 = vmatmul.msk.f32.vlgmr.msrb.gmra.mxu0 %vm475_vm12, %v259_v31 }
 0x247   : > { %v522_v34 = vpop.f32.mrf.mxu1  ;;  %v502_v35 = vpop.f32.mrf.mxu0 }
 0x248   : > { %v527_v36 = vrot.slane %v522_v34, 4 }
 0x24a   : > { %v528_v37 = vsel %vm277_vm0, %v502_v35, %v527_v36 }
 0x24b   : > { %v530_v38 = vadd.f32 %v528_v37, %v705_v2 }
 0x24d   : > { %531 = vst [vmem:[%s251_s30] sm:$0xff] %v530_v38 }
 0x24e PF: > { %s16_s21 = sadd.s32 1, %s639_s21  }
 0x24f   : > { %p13_p4 = scmp.ge.s32.totalorder %s16_s21, 4  }
 0x251   :  { %15 = sbr.rel (!%p13_p4) target bundleno = 1 (0x1), region = 74 }

</bundles_post_ra>
